<compile_context>
chip_gen: v7x
topology: tpu7x:2x2x1
jax: 0.10.0
libtpu: 0.0.40
codegen_flags: <defaults>
</compile_context>

<pallas_src>
import functools
import math

import jax
import jax.numpy as jnp
from jax import lax
from jax.experimental import pallas as pl
from jax.experimental.pallas import tpu as pltpu


# ----------------------------- tiling helpers -----------------------------

def _round_up(x: int, m: int) -> int:
    return (x + m - 1) // m * m


def _cdiv(a: int, b: int) -> int:
    return (a + b - 1) // b


def _vmem_params():
    """Returns (per-block byte budget for the f32 working set, vmem_limit_bytes)."""
    phys = 64 * 1024 * 1024  # conservative default (v7x-sized VMEM)
    try:
        phys = int(pltpu.get_tpu_info().vmem_capacity_bytes)
    except Exception:
        pass
    if phys >= 96 * 1024 * 1024:                 # v5e / v6e: 128 MiB physical
        return 6 * 1024 * 1024, 80 * 1024 * 1024
    return 3 * 1024 * 1024, 40 * 1024 * 1024     # v7x: 64 MiB physical


def _pick_block_rows(rows: int, width: int, budget_bytes: int) -> int:
    """Rows per block for a (rows, width) slab normalized along `width`."""
    if rows < 8:
        return rows                               # full-extent block is legal
    row_bytes = _round_up(width, 128) * 4         # f32 working set, lane-padded
    tgt = budget_bytes // row_bytes
    tgt = min(tgt, _cdiv(rows, 4))                # keep >=~4 grid steps (megacore + pipeline)
    tgt = max(8, (tgt // 8) * 8)                  # sublane multiple
    return min(tgt, _round_up(rows, 8))


def _pick_hw_tile(hw: int, c: int, n: int, budget_bytes: int) -> int:
    """Spatial (lane) tile for the channels_first (N, C, H*W) layout."""
    if hw <= 128:
        return hw                                 # full-extent block is legal
    col_bytes = _round_up(c, 8) * 4
    tgt = budget_bytes // col_bytes
    want_tiles = _cdiv(4, max(n, 1))              # keep >=~4 total grid steps
    tgt = min(tgt, _cdiv(hw, want_tiles))
    tgt = max(128, (tgt // 128) * 128)            # lane multiple
    return min(tgt, _round_up(hw, 128))


# -------------------------------- kernels ---------------------------------

def _ln_rows_kernel(x_ref, w_ref, b_ref, o_ref, *, eps):
    # x_ref: (block_rows, C); w_ref/b_ref: (1, C).  Normalize each row over C.
    x = x_ref[...].astype(jnp.float32)
    mean = jnp.mean(x, axis=-1, keepdims=True)
    xc = x - mean
    var = jnp.mean(xc * xc, axis=-1, keepdims=True)   # biased variance (torch)
    y = xc * lax.rsqrt(var + eps)
    y = y * w_ref[...].astype(jnp.float32) + b_ref[...].astype(jnp.float32)
    o_ref[...] = y.astype(o_ref.dtype)


def _ln_rows_packed_kernel(x_ref, w_ref, b_ref, o_ref, *, eps, c, k):
    # x_ref: (block_rows, k*C) — k independent length-C rows packed along lanes
    # so loads/stores/DMAs are lane-dense.  Per-segment stats via one-hot
    # segment matmuls (MXU is idle in this memory-bound kernel).
    kc = k * c
    x = x_ref[...].astype(jnp.float32)
    seg = lax.broadcasted_iota(jnp.int32, (kc, k), 0) // c
    s = (seg == lax.broadcasted_iota(jnp.int32, (kc, k), 1)).astype(jnp.float32)
    seg_t = lax.broadcasted_iota(jnp.int32, (k, kc), 1) // c
    st = (seg_t == lax.broadcasted_iota(jnp.int32, (k, kc), 0)).astype(jnp.float32)

    hi = lax.Precision.HIGHEST
    inv_c = jnp.float32(1.0 / c)
    mean = jnp.dot(x, s, precision=hi, preferred_element_type=jnp.float32) * inv_c
    xc = x - jnp.dot(mean, st, precision=hi, preferred_element_type=jnp.float32)
    var = jnp.dot(xc * xc, s, precision=hi, preferred_element_type=jnp.float32) * inv_c
    inv = lax.rsqrt(var + eps)
    y = xc * jnp.dot(inv, st, precision=hi, preferred_element_type=jnp.float32)
    y = y * w_ref[...].astype(jnp.float32) + b_ref[...].astype(jnp.float32)
    o_ref[...] = y.astype(o_ref.dtype)


def _ln_cfirst_kernel(x_ref, w_ref, b_ref, o_ref, *, eps):
    # x_ref: (1, C, hw_tile); w_ref/b_ref: (C, 1).  Normalize over C (sublanes);
    # spatial positions live on the dense lane axis.
    x = x_ref[0].astype(jnp.float32)                  # (C, hw_tile)
    mean = jnp.mean(x, axis=0, keepdims=True)
    xc = x - mean
    var = jnp.mean(xc * xc, axis=0, keepdims=True)
    y = xc * lax.rsqrt(var + eps)
    y = y * w_ref[...].astype(jnp.float32) + b_ref[...].astype(jnp.float32)
    o_ref[0] = y.astype(o_ref.dtype)


# ------------------------------ pallas calls -------------------------------

def _ln_rows_call(kernel, x2, w2, b2, vmem_limit, block_rows):
    rows, width = x2.shape
    grid = (_cdiv(rows, block_rows),)
    return pl.pallas_call(
        kernel,
        out_shape=jax.ShapeDtypeStruct((rows, width), x2.dtype),
        grid_spec=pltpu.PrefetchScalarGridSpec(
            num_scalar_prefetch=0,
            grid=grid,
            in_specs=[
                pl.BlockSpec((block_rows, width), lambda i: (i, 0)),
                pl.BlockSpec((1, width), lambda i: (0, 0)),
                pl.BlockSpec((1, width), lambda i: (0, 0)),
            ],
            out_specs=pl.BlockSpec((block_rows, width), lambda i: (i, 0)),
        ),
        compiler_params=pltpu.CompilerParams(
            dimension_semantics=("parallel",),
            vmem_limit_bytes=vmem_limit,
        ),
    )(x2, w2, b2)


def _layernorm_channels_last(x, weight, bias, eps):
    budget, vmem_limit = _vmem_params()
    c = x.shape[-1]
    rows = math.prod(x.shape[:-1]) if x.ndim > 1 else 1

    # Lane-dense packing for small C (e.g. ConvNeXt C=96 and the tests below).
    k = 1
    if c < 128:
        k_cand = 128 // math.gcd(c, 128)
        if k_cand * c <= 1024 and rows >= k_cand and rows % k_cand == 0:
            k = k_cand

    if k > 1:
        kc = k * c
        x2 = x.reshape(rows // k, kc)
        w2 = jnp.tile(weight.reshape(1, c), (1, k))
        b2 = jnp.tile(bias.reshape(1, c), (1, k))
        kern = functools.partial(_ln_rows_packed_kernel, eps=eps, c=c, k=k)
        br = _pick_block_rows(rows // k, kc, budget)
        y2 = _ln_rows_call(kern, x2, w2, b2, vmem_limit, br)
    else:
        x2 = x.reshape(rows, c)
        kern = functools.partial(_ln_rows_kernel, eps=eps)
        br = _pick_block_rows(rows, c, budget)
        y2 = _ln_rows_call(kern, x2, weight.reshape(1, c), bias.reshape(1, c),
                           vmem_limit, br)
    return y2.reshape(x.shape)


def _layernorm_channels_first(x, weight, bias, eps):
    budget, vmem_limit = _vmem_params()
    n, c, h, w = x.shape
    hw = h * w
    x3 = x.reshape(n, c, hw)          # no NCHW<->NHWC transposes
    t = _pick_hw_tile(hw, c, n, budget)
    grid = (n, _cdiv(hw, t))
    kern = functools.partial(_ln_cfirst_kernel, eps=eps)
    y3 = pl.pallas_call(
        kern,
        out_shape=jax.ShapeDtypeStruct((n, c, hw), x.dtype),
        grid_spec=pltpu.PrefetchScalarGridSpec(
            num_scalar_prefetch=0,
            grid=grid,
            in_specs=[
                pl.BlockSpec((1, c, t), lambda i, j: (i, 0, j)),
                pl.BlockSpec((c, 1), lambda i, j: (0, 0)),
                pl.BlockSpec((c, 1), lambda i, j: (0, 0)),
            ],
            out_specs=pl.BlockSpec((1, c, t), lambda i, j: (i, 0, j)),
        ),
        compiler_params=pltpu.CompilerParams(
            dimension_semantics=("parallel", "parallel"),
            vmem_limit_bytes=vmem_limit,
        ),
    )(x3, weight.reshape(c, 1), bias.reshape(c, 1))
    return y3.reshape(n, c, h, w)


def layer_norm(x, weight, bias, eps=1e-6, data_format="channels_last"):
    """ConvNeXt LayerNorm.

    channels_last : x is (..., C), normalized over the last axis.
    channels_first: x is (N, C, H, W), normalized over axis 1.
    """
    if data_format not in ("channels_last", "channels_first"):
        raise NotImplementedError
    if data_format == "channels_last":
        return _layernorm_channels_last(x, weight, bias, eps)
    return _layernorm_channels_first(x, weight, bias, eps)


# ------------------------------ reference ---------------------------------

def _reference(x, weight, bias, eps, data_format):
    if data_format == "channels_last":
        mean = jnp.mean(x, axis=-1, keepdims=True)
        var = jnp.mean((x - mean) ** 2, axis=-1, keepdims=True)
        return (x - mean) / jnp.sqrt(var + eps) * weight + bias
    else:
        mean = jnp.mean(x, axis=1, keepdims=True)
        var = jnp.mean((x - mean) ** 2, axis=1, keepdims=True)
        xn = (x - mean) / jnp.sqrt(var + eps)
        return weight[None, :, None, None] * xn + bias[None, :, None, None]


if __name__ == "__main__":
    key = jax.random.PRNGKey(0)
    eps = 1e-6
    ln = jax.jit(layer_norm, static_argnames=("eps", "data_format"))

    k1, k2, k3, kw = jax.random.split(key, 4)

    # --- channels_first (NCHW, as PyTorch convs produce) ---
    n, c, h, w = 2, 4, 16, 16
    x_cf = jax.random.normal(k1, (n, c, h, w), dtype=jnp.float32)
    w_cf = 1.0 + 0.1 * jax.random.normal(kw, (c,), dtype=jnp.float32)
    b_cf = 0.1 * jax.random.normal(k3, (c,), dtype=jnp.float32)
    y_cf = jax.block_until_ready(
        ln(x_cf, w_cf, b_cf, eps=eps, data_format="channels_first"))
    ref_cf = _reference(x_cf, w_cf, b_cf, eps, "channels_first")
    assert jnp.allclose(y_cf, ref_cf, atol=1e-4, rtol=1e-4)

    # --- channels_last, small C (exercises the lane-dense packed kernel) ---
    c2 = 32
    x_cl = jax.random.normal(k2, (2, 8, 8, c2), dtype=jnp.float32)
    w_cl = 1.0 + 0.1 * jax.random.normal(k1, (c2,), dtype=jnp.float32)
    b_cl = 0.1 * jax.random.normal(k2, (c2,), dtype=jnp.float32)
    y_cl = jax.block_until_ready(
        ln(x_cl, w_cl, b_cl, eps=eps, data_format="channels_last"))
    ref_cl = _reference(x_cl, w_cl, b_cl, eps, "channels_last")
    assert jnp.allclose(y_cl, ref_cl, atol=1e-4, rtol=1e-4)

    # --- channels_last, lane-aligned C (plain kernel + cdiv edge block) ---
    c3 = 256
    x_cw = jax.random.normal(k3, (2, 5, c3), dtype=jnp.float32)
    w_cw = 1.0 + 0.1 * jax.random.normal(kw, (c3,), dtype=jnp.float32)
    b_cw = 0.1 * jax.random.normal(k1, (c3,), dtype=jnp.float32)
    y_cw = jax.block_until_ready(
        ln(x_cw, w_cw, b_cw, eps=eps, data_format="channels_last"))
    ref_cw = _reference(x_cw, w_cw, b_cw, eps, "channels_last")
    assert jnp.allclose(y_cw, ref_cw, atol=1e-4, rtol=1e-4)

    print("KERNEL_OK")
</pallas_src>

<mosaic_0001>
module attributes {stable_mosaic.version = 11 : i64} {
  func.func @_ln_cfirst_kernel(%arg0: i32, %arg1: i32, %arg2: memref<1x4x128xf32, #tpu.memory_space<vmem>>, %arg3: memref<4x1xf32, #tpu.memory_space<vmem>>, %arg4: memref<4x1xf32, #tpu.memory_space<vmem>>, %arg5: memref<1x4x128xf32, #tpu.memory_space<vmem>>) attributes {dimension_semantics = [#tpu.dimension_semantics<parallel>, #tpu.dimension_semantics<parallel>], iteration_bounds = array<i64: 2, 2>, scalar_prefetch = 0 : i64, scratch_operands = 0 : i64, tpu.core_type = #tpu.core_type<tc>, window_params = [{transform_indices = @transform_0, window_bounds = array<i64: 1, 4, 128>}, {pipeline_mode = #tpu.pipeline_mode<synchronous>, transform_indices = @transform_1, window_bounds = array<i64: 4, 1>}, {pipeline_mode = #tpu.pipeline_mode<synchronous>, transform_indices = @transform_2, window_bounds = array<i64: 4, 1>}, {transform_indices = @transform_3, window_bounds = array<i64: 1, 4, 128>}]} {
    %c0 = arith.constant 0 : index
    %c0_0 = arith.constant 0 : index
    %c0_1 = arith.constant 0 : index
    %0 = vector.load %arg2[%c0, %c0_0, %c0_1] : memref<1x4x128xf32, #tpu.memory_space<vmem>>, vector<1x4x128xf32>
    %1 = vector.shape_cast %0 : vector<1x4x128xf32> to vector<4x128xf32>
    %cst = arith.constant dense<0.000000e+00> : vector<128xf32>
    %2 = vector.multi_reduction <add>, %1, %cst [0] : vector<4x128xf32> to vector<128xf32>
    %3 = vector.shape_cast %2 : vector<128xf32> to vector<1x128xf32>
    %cst_2 = arith.constant 4.000000e+00 : f32
    %4 = vector.broadcast %cst_2 : f32 to vector<1x128xf32>
    %5 = arith.divf %3, %4 : vector<1x128xf32>
    %6 = vector.broadcast %5 : vector<1x128xf32> to vector<4x128xf32>
    %7 = arith.subf %1, %6 : vector<4x128xf32>
    %8 = arith.mulf %7, %7 : vector<4x128xf32>
    %cst_3 = arith.constant dense<0.000000e+00> : vector<128xf32>
    %9 = vector.multi_reduction <add>, %8, %cst_3 [0] : vector<4x128xf32> to vector<128xf32>
    %10 = vector.shape_cast %9 : vector<128xf32> to vector<1x128xf32>
    %cst_4 = arith.constant 4.000000e+00 : f32
    %11 = vector.broadcast %cst_4 : f32 to vector<1x128xf32>
    %12 = arith.divf %10, %11 : vector<1x128xf32>
    %cst_5 = arith.constant 9.99999997E-7 : f32
    %13 = vector.broadcast %cst_5 : f32 to vector<1x128xf32>
    %14 = arith.addf %12, %13 : vector<1x128xf32>
    %15 = math.rsqrt %14 : vector<1x128xf32>
    %16 = vector.broadcast %15 : vector<1x128xf32> to vector<4x128xf32>
    %17 = arith.mulf %7, %16 : vector<4x128xf32>
    %c0_6 = arith.constant 0 : index
    %c0_7 = arith.constant 0 : index
    %18 = vector.load %arg3[%c0_6, %c0_7] : memref<4x1xf32, #tpu.memory_space<vmem>>, vector<4x1xf32>
    %19 = vector.broadcast %18 : vector<4x1xf32> to vector<4x128xf32>
    %20 = arith.mulf %17, %19 : vector<4x128xf32>
    %c0_8 = arith.constant 0 : index
    %c0_9 = arith.constant 0 : index
    %21 = vector.load %arg4[%c0_8, %c0_9] : memref<4x1xf32, #tpu.memory_space<vmem>>, vector<4x1xf32>
    %22 = vector.broadcast %21 : vector<4x1xf32> to vector<4x128xf32>
    %23 = arith.addf %20, %22 : vector<4x128xf32>
    %c0_10 = arith.constant 0 : index
    %c0_11 = arith.constant 0 : index
    %c0_12 = arith.constant 0 : index
    %24 = vector.load %arg5[%c0_10, %c0_11, %c0_12] : memref<1x4x128xf32, #tpu.memory_space<vmem>>, vector<1x4x128xf32>
    %25 = vector.shape_cast %24 : vector<1x4x128xf32> to vector<4x128xf32>
    %26 = vector.shape_cast %23 : vector<4x128xf32> to vector<1x4x128xf32>
    tpu.vector_store %arg5[%c0_10, %c0_11, %c0_12], %26 {strides = array<i32>} : memref<1x4x128xf32, #tpu.memory_space<vmem>>, vector<1x4x128xf32>,
    return
  }
  func.func @transform_0(%arg0: i32, %arg1: i32) -> (i32, i32, i32) {
    %c0_i32 = arith.constant 0 : i32
    %c0_i32_0 = arith.constant 0 : i32
    return %arg0, %c0_i32, %arg1 : i32, i32, i32
  }
  func.func @transform_1(%arg0: i32, %arg1: i32) -> (i32, i32) {
    %c0_i32 = arith.constant 0 : i32
    %c0_i32_0 = arith.constant 0 : i32
    %c0_i32_1 = arith.constant 0 : i32
    return %c0_i32, %c0_i32_0 : i32, i32
  }
  func.func @transform_2(%arg0: i32, %arg1: i32) -> (i32, i32) {
    %c0_i32 = arith.constant 0 : i32
    %c0_i32_0 = arith.constant 0 : i32
    %c0_i32_1 = arith.constant 0 : i32
    return %c0_i32, %c0_i32_0 : i32, i32
  }
  func.func @transform_3(%arg0: i32, %arg1: i32) -> (i32, i32, i32) {
    %c0_i32 = arith.constant 0 : i32
    %c0_i32_0 = arith.constant 0 : i32
    return %arg0, %c0_i32, %arg1 : i32, i32, i32
  }
}

</mosaic_0001>

<bundles_post_ra>
// kernel: layer_norm.1
= control target key start
LH: loop header
LB: loop body
LE: loop exit
PB: predicated region body
PF: predicated region fallthrough
CT: control target
= control target key end

     0   :  { %s443_s12 = smov 0   ;;  %s445_s13 = smov 0   ;;  %s507_s0 = inlined_call_operand.vmem [shape: f32[2,4,256], index: 0, kind: input, shape index: {}]   ;;  %s508_s1 = inlined_call_operand.vmem [shape: f32[4,1], index: 1, kind: input, shape index: {}]   ;;  %s509_s2 = inlined_call_operand.vmem [shape: f32[4,1], index: 2, kind: input, shape index: {}]   ;;  %s510_s3 = inlined_call_operand.vmem [shape: f32[2,4,256], index: 3, kind: output, shape index: {}]  }
   0x1   :  { %s447_s14 = smov 0   ;;  %s449_s15 = smov 0  }
   0x2   :  { %s451_s16 = smov 0  }
   0x3 LB: > { %s22_s17 = sadd.s32 1, %s412_s14  ;;  %s25_s18 = sadd.s32 1, %s416_s15  ;;  %s420_s16 = sphi %s451_s16, %s13_s16   ;;  %s416_s15 = sphi %s449_s15, %s514_s15   ;;  %s412_s14 = sphi %s447_s14, %s513_s14   ;;  %s408_s13 = sphi %s445_s13, %s512_s13   ;;  %s404_s12 = sphi %s443_s12, %s511_s12  }
   0x4   : > { %p23_p0 = scmp.ge.s32.totalorder %s22_s17, 2  ;;  %p331_p1 = scmp.ge.s32.totalorder %s420_s16, 1 }
   0x5   : > { %p156_p2 = scmp.lt.s32.totalorder %s420_s16, 5 }
   0x6   : > { %s516_s17 = smov (%p23_p0, %s22_s17), 0  ;;  %s518_s18 = smov (!%p23_p0, %s25_s18), %s416_s15 }
   0x7   : > { %p157_p3 = pnand %p331_p1, %p156_p2  ;;  %p27_p4 = scmp.ge.s32.totalorder %s518_s18, 2 }
   0x8   : > { %v226_v0 = vld [vmem:[%s508_s1] sm:$0xf] (!%p157_p3)  ;;  %v422_v1 = vmov (!%p157_p3), 0   ;;  %p186_p5 = scmp.lt.s32.totalorder (!%p157_p3), %s408_s13, 1  ;;  %p188_p6 = scmp.lt.s32.totalorder (!%p157_p3), %s404_s12, 1  ;;  %vm203_vm0 = vcmask (!%p157_p3), 1043456  }
   0x9   : > { %s520_s18 = smov (%p27_p4, %s518_s18), 0  ;;  %160 = sbr.rel (%p157_p3) target bundleno = 146 (0x92), region = 32 }
   0xa   : > { %379 = vset.pattern.permute.xlu0 (!%p157_p3), %v422_v1  ;;  %v233_v2 = vld [vmem:[%s509_s2] sm:$0xf] (!%p157_p3) }
   0xb   : > { %229 = vperm.xlu0 (!%p157_p3), %379, %v226_v0  }
   0xf   : > { %236 = vperm.xlu0 (!%p157_p3), %379, %v233_v2  }
  0x10   : > { %s522_s13 = smov (!%p186_p5, %s408_s13), 1  ;;  %s524_s12 = smov (!%p188_p6, %s404_s12), 1 }
  0x11   : > { %s332_s23 = sshll.u32 %s522_s13, 1 }
  0x12   : > { %s479_s24 = sadd.s32 %s332_s23, %s524_s12 }
  0x13   : > { %s333_s25 = sshll.u32 %s479_s24, 2 }
  0x14   : > { %s193_s28 = scalar_lea.vmem %s507_s0, %s333_s25  ;;  %s201_s4 = scalar_lea.vmem %s510_s3, %s333_s25 }
  0x15   : > { %v202_v3 = vld [vmem:[%s193_s28] sm:$0xf] }
  0x16   : > { %v204_v4 = vsel %vm203_vm0, %v202_v3, 0.0 }
  0x17   : > { %v205_v5 = vrot.slane %v204_v4, 4 }
  0x19   : > { %v206_v6 = vadd.f32 %v205_v5, %v204_v4 }
  0x1b   : > { %v207_v7 = vrot.slane %v206_v6, 2 }
  0x1d   : > { %v208_v8 = vadd.f32 %v207_v7, %v206_v6 }
  0x1f   : > { %v209_v9 = vrot.slane %v208_v8, 1 }
  0x21   : > { %v210_v10 = vadd.f32 %v209_v9, %v208_v8 }
  0x23   : > { %v212_v11 = vmul.f32 0.25, %v210_v10 }
  0x25   : > { %v213_v12 = vsub.f32 %v202_v3, %v212_v11 }
  0x27   : > { %v214_v13 = vmul.f32 %v213_v12, %v213_v12 }
  0x29   : > { %v215_v14 = vsel %vm203_vm0, %v214_v13, 0.0 }
  0x2a   : > { %v216_v15 = vrot.slane %v215_v14, 4 }
  0x2c   : > { %v217_v16 = vadd.f32 %v216_v15, %v215_v14 }
  0x2e   : > { %v218_v17 = vrot.slane %v217_v16, 2 }
  0x30   : > { %v219_v18 = vadd.f32 %v218_v17, %v217_v16 }
  0x32   : > { %v220_v19 = vrot.slane %v219_v18, 1 }
  0x34   : > { %v221_v20 = vadd.f32 %v220_v19, %v219_v18 }
  0x36   : > { %v222_v21 = vmul.f32 0.25, %v221_v20 }
  0x38   : > { %v223_v22 = vadd.f32 1e-06, %v222_v21 }
  0x3a   : > { %380 = vrsqrt.f32 %v223_v22 }
  0x44   : > { %v381_v23 = vpop.eup %380 }
  0x45   : > { %v225_v24 = vmul.f32 %v381_v23, %v213_v12 }
  0x8a   : > { %v230_v25 = vpop.permute.xlu0 %229 }
  0x8b   : > { %v232_v26 = vmul.f32 %v230_v25, %v225_v24 }
  0x8e   : > { %v237_v27 = vpop.permute.xlu0 %236 }
  0x8f   : > { %v239_v28 = vadd.f32 %v237_v27, %v232_v26 }
  0x91   : > { %240 = vst [vmem:[%s201_s4] sm:$0xf] %v239_v28 }
  0x92 PF: > { %s13_s16 = sadd.s32 1, %s420_s16   ;;  %s511_s12 = smov %s412_s14 }
  0x93   : > { %p10_p7 = scmp.ge.s32.totalorder %s13_s16, 6   ;;  %s512_s13 = smov %s416_s15 }
  0x94   : > { %s513_s14 = smov %s516_s17  ;;  %s514_s15 = smov %s520_s18 }
  0x95   :  { %12 = sbr.rel (!%p10_p7) target bundleno = 3 (0x3), region = 62 }

</bundles_post_ra>
